<compile_context>
chip_gen: v5e
topology: v5e:2x2
jax: 0.10.0
libtpu: 0.0.40
codegen_flags: <defaults>
</compile_context>

<pallas_src>
import functools

import jax
import jax.numpy as jnp
from jax import lax
from jax.experimental import pallas as pl
from jax.experimental.pallas import tpu as pltpu


def _round_up(x: int, m: int) -> int:
    return ((x + m - 1) // m) * m


def _cola_embedding_kernel(ids_ref, w_hbm, a_ref, b_t_ref, out_ref,
                           w_buf, sem, *, scaling, tile_n, tiles_per_chunk):
    # ids_ref : (n_pad,) int32 in SMEM (scalar prefetch)  -- token ids
    # w_hbm   : (V, D)      base embedding table, left in HBM (manual gather)
    # a_ref   : (tile_n, R) after_A rows (gathered in the wrapper), pipelined
    # b_t_ref : (R, D)      lora_embedding_B.T, resident in VMEM
    # out_ref : (tile_n, D) output block
    # w_buf   : (2, tile_n, D) VMEM scratch -- double-buffered gathered rows
    # sem     : (2,) DMA semaphores, one per buffer slot
    i = pl.program_id(0)            # core chunk       ("parallel")
    j = pl.program_id(1)            # tile within chunk ("arbitrary")
    T = tiles_per_chunk
    slot = lax.rem(j, 2)

    def issue_gather(global_tile, s):
        base = global_tile * tile_n

        def body(t, carry):
            row = ids_ref[base + t]
            pltpu.make_async_copy(w_hbm.at[row], w_buf.at[s, t],
                                  sem.at[s]).start()
            return carry

        # Unrolled so the LLO scheduler can pipeline sld -> descriptor issue.
        lax.fori_loop(0, tile_n, body, None, unroll=min(8, tile_n))

    # Prime this chunk's first tile (each chunk/core self-primes at j == 0, so
    # megacore sharding of the outer "parallel" axis stays correct).
    @pl.when(j == 0)
    def _():
        issue_gather(i * T, 0)

    # Prefetch the next tile's rows into the other slot; these DMAs are in
    # flight while we wait on / compute with the current slot.
    if T > 1:
        @pl.when(j + 1 < T)
        def _():
            issue_gather(i * T + j + 1, 1 - slot)

    # One coarse wait per tile: DMA semaphores count bytes, so a descriptor
    # spanning the whole (tile_n, D) slot waits for all tile_n row copies.
    pltpu.make_async_copy(w_buf.at[slot], w_buf.at[slot], sem.at[slot]).wait()

    # LoRA path: scale the small (tile_n, R) operand (native dtype), then one
    # rank-R MXU matmul with f32 accumulation.
    a = a_ref[...]
    a_scaled = a * jnp.asarray(scaling, dtype=a.dtype)
    lora = jnp.dot(a_scaled, b_t_ref[...], preferred_element_type=jnp.float32)

    out_ref[...] = (w_buf[slot].astype(jnp.float32) + lora).astype(out_ref.dtype)


def cola_embedding_forward(ids, weight, lora_A, lora_B, scaling, *, tile_n=None):
    """ids: (B, S) int; weight: (V, D); lora_A: (R, V); lora_B: (D, R)."""
    B, S = ids.shape
    V, D = weight.shape
    R, V_a = lora_A.shape
    D_b, R_b = lora_B.shape
    assert V_a == V and D_b == D and R_b == R

    N = B * S
    w_bytes = jnp.dtype(weight.dtype).itemsize
    a_bytes = jnp.dtype(lora_A.dtype).itemsize
    b_bytes = jnp.dtype(lora_B.dtype).itemsize

    # VMEM estimate per token tile: gather double-buffer + Pallas-pipelined
    # output / after_A blocks + the resident B.T block.  Budgeted for v7x's
    # 64 MiB VMEM (also fine on v5e/v6e's 128 MiB).
    def vmem_bytes(tn):
        return (2 * tn * D * w_bytes          # w_buf scratch (2 slots)
                + 2 * tn * D * w_bytes        # output blocks (double-buffered)
                + 2 * tn * R * a_bytes        # after_A blocks (double-buffered)
                + 2 * R * D * b_bytes)        # B.T block

    if tile_n is None:
        tile_n = 256
        if N <= tile_n:
            # Keep >= 2 token tiles so both v7x TensorCores get work.
            tile_n = max(8, _round_up((N + 1) // 2, 8))
    tile_n = max(8, _round_up(tile_n, 8))
    while tile_n > 8 and vmem_bytes(tile_n) > 48 * 1024 * 1024:
        tile_n = max(8, _round_up(tile_n // 2, 8))

    tiles = -(-N // tile_n)                    # number of (tile_n, D) out tiles
    # Factor the token-tile axis as (chunks, tiles_per_chunk).  chunks == 2 is
    # marked "parallel" so v7x splits the work across its 2 TensorCores; each
    # chunk self-primes its gather double-buffer, so the split is safe.
    if tiles % 2 == 0:
        chunks, tiles_per_chunk = 2, tiles // 2
    else:
        chunks, tiles_per_chunk = 1, tiles     # odd tile count: single chunk

    n_pad = tiles * tile_n
    ids_flat = ids.reshape(N).astype(jnp.int32)
    if n_pad != N:
        ids_flat = jnp.pad(ids_flat, (0, n_pad - N))   # pad id 0 -> valid row

    # after_A = lora_A.T[ids]: only (n_pad, R) -- cheap XLA gather done once in
    # the wrapper, fed as a pipelined input (no 32-byte per-token DMAs).
    after_a = lora_A.T[ids_flat]               # (n_pad, R)
    b_t = lora_B.T                              # (R, D)

    kernel = functools.partial(_cola_embedding_kernel, scaling=float(scaling),
                               tile_n=tile_n, tiles_per_chunk=tiles_per_chunk)

    T = tiles_per_chunk
    vmem_limit = int(min(60 * 1024 * 1024,
                         max(32 * 1024 * 1024, vmem_bytes(tile_n) + (4 << 20))))

    out = pl.pallas_call(
        kernel,
        out_shape=jax.ShapeDtypeStruct((N, D), weight.dtype),  # no out[:N] copy
        grid_spec=pltpu.PrefetchScalarGridSpec(
            num_scalar_prefetch=1,                              # ids -> SMEM
            grid=(chunks, tiles_per_chunk),
            in_specs=[
                pl.BlockSpec(memory_space=pl.ANY),              # weight in HBM
                pl.BlockSpec((tile_n, R), lambda i, j, ids: (i * T + j, 0)),
                pl.BlockSpec((R, D), lambda i, j, ids: (0, 0)),
            ],
            out_specs=pl.BlockSpec((tile_n, D), lambda i, j, ids: (i * T + j, 0)),
            scratch_shapes=[
                pltpu.VMEM((2, tile_n, D), weight.dtype),       # gathered rows
                pltpu.SemaphoreType.DMA((2,)),
            ],
        ),
        compiler_params=pltpu.CompilerParams(
            dimension_semantics=("parallel", "arbitrary"),
            vmem_limit_bytes=vmem_limit),
    )(ids_flat, weight, after_a, b_t)

    return out.reshape(B, S, D)


if __name__ == "__main__":
    # Small, module-consistent shapes (D a multiple of 128 -> lane-dense stores).
    B, S = 2, 8            # batch, sequence
    V, D = 64, 256         # num_embeddings (in_features), embedding_dim (out_features)
    R = 8                  # LoRA rank
    lora_alpha = 16
    scaling = lora_alpha / R

    key = jax.random.PRNGKey(0)
    k_ids, k_w, k_a, k_b = jax.random.split(key, 4)

    ids = jax.random.randint(k_ids, (B, S), 0, V, dtype=jnp.int32)
    weight = jax.random.normal(k_w, (V, D), dtype=jnp.float32)   # base_layer.weight
    # peft's default init zeros lora_embedding_A; use non-zero values so the
    # LoRA path is actually exercised.
    lora_A = jax.random.normal(k_a, (R, V), dtype=jnp.float32)   # lora_embedding_A
    lora_B = jax.random.normal(k_b, (D, R), dtype=jnp.float32)   # lora_embedding_B

    out = cola_embedding_forward(ids, weight, lora_A, lora_B, scaling)
    out = jax.block_until_ready(out)

    # Pure-JAX reference.
    base_ref = weight[ids]                       # (B, S, D)
    after_a_ref = lora_A.T[ids]                  # (B, S, R)
    ref = base_ref + (after_a_ref @ lora_B.T) * scaling

    assert out.shape == (B, S, D)
    assert jnp.allclose(out, ref, atol=1e-4, rtol=1e-4)

    print("KERNEL_OK")
</pallas_src>

<mosaic_0001>
module attributes {stable_mosaic.version = 11 : i64} {
  func.func @_cola_embedding_kernel(%arg0: i32, %arg1: i32, %arg2: memref<16xi32, #tpu.memory_space<smem>>, %arg3: memref<64x256xf32, #tpu.memory_space<any>>, %arg4: memref<8x8xf32, #tpu.memory_space<vmem>>, %arg5: memref<8x256xf32, #tpu.memory_space<vmem>>, %arg6: memref<8x256xf32, #tpu.memory_space<vmem>>, %arg7: memref<2x8x256xf32, #tpu.memory_space<vmem>>, %arg8: memref<2x!tpu.dma_semaphore, #tpu.memory_space<semaphore_mem>>) attributes {dimension_semantics = [#tpu.dimension_semantics<parallel>, #tpu.dimension_semantics<arbitrary>], iteration_bounds = array<i64: 2, 1>, scalar_prefetch = 1 : i64, scratch_operands = 2 : i64, tpu.core_type = #tpu.core_type<tc>, window_params = [{}, {transform_indices = @transform_1, window_bounds = array<i64: 8, 8>}, {pipeline_mode = #tpu.pipeline_mode<synchronous>, transform_indices = @transform_2, window_bounds = array<i64: 8, 256>}, {transform_indices = @transform_3, window_bounds = array<i64: 8, 256>}]} {
    %c2_i32 = arith.constant 2 : i32
    %0 = arith.remsi %arg1, %c2_i32 : i32
    %c0_i32 = arith.constant 0 : i32
    %1 = arith.cmpi eq, %arg1, %c0_i32 : i32
    %2 = arith.extui %1 : i1 to i32
    %c0_i32_0 = arith.constant 0 : i32
    %3 = arith.cmpi ne, %2, %c0_i32_0 : i32
    scf.if %3 {
      %c1_i32 = arith.constant 1 : i32
      %20 = arith.muli %arg0, %c1_i32 : i32
      %c8_i32 = arith.constant 8 : i32
      %21 = arith.muli %20, %c8_i32 : i32
      %c0_i32_13 = arith.constant 0 : i32
      %22 = arith.addi %21, %c0_i32_13 : i32
      %23 = arith.index_cast %22 : i32 to index
      %24 = memref.load %arg2[%23] : memref<16xi32, #tpu.memory_space<smem>>
      %c0_i32_14 = arith.constant 0 : i32
      %c0_i32_15 = arith.constant 0 : i32
      %c0_i32_16 = arith.constant 0 : i32
      %25 = tpu.memref_slice %arg3[%24, %c0_i32_16] : memref<64x256xf32, #tpu.memory_space<any>> -> memref<1x256xf32, #tpu.memory_space<any>>
      %26 = tpu.memref_squeeze %25 : memref<1x256xf32, #tpu.memory_space<any>> -> memref<256xf32, #tpu.memory_space<any>>
      %c0_i32_17 = arith.constant 0 : i32
      %27 = tpu.memref_slice %arg7[%c0_i32_14, %c0_i32_13, %c0_i32_17] : memref<2x8x256xf32, #tpu.memory_space<vmem>> -> memref<1x1x256xf32, #tpu.memory_space<vmem>>
      %28 = tpu.memref_squeeze %27 : memref<1x1x256xf32, #tpu.memory_space<vmem>> -> memref<256xf32, #tpu.memory_space<vmem>>
      %29 = tpu.memref_slice %arg8[%c0_i32_15] : memref<2x!tpu.dma_semaphore, #tpu.memory_space<semaphore_mem>> -> memref<1x!tpu.dma_semaphore, #tpu.memory_space<semaphore_mem>>
      %30 = tpu.memref_squeeze %29 : memref<1x!tpu.dma_semaphore, #tpu.memory_space<semaphore_mem>> -> memref<!tpu.dma_semaphore, #tpu.memory_space<semaphore_mem>>
      tpu.enqueue_dma source(%26 : memref<256xf32, #tpu.memory_space<any>>) target(%28 : memref<256xf32, #tpu.memory_space<vmem>>) target_semaphore(%30 : memref<!tpu.dma_semaphore, #tpu.memory_space<semaphore_mem>>)
      %c1_i32_18 = arith.constant 1 : i32
      %31 = arith.addi %21, %c1_i32_18 : i32
      %32 = arith.index_cast %31 : i32 to index
      %33 = memref.load %arg2[%32] : memref<16xi32, #tpu.memory_space<smem>>
      %c0_i32_19 = arith.constant 0 : i32
      %c0_i32_20 = arith.constant 0 : i32
      %c0_i32_21 = arith.constant 0 : i32
      %34 = tpu.memref_slice %arg3[%33, %c0_i32_21] : memref<64x256xf32, #tpu.memory_space<any>> -> memref<1x256xf32, #tpu.memory_space<any>>
      %35 = tpu.memref_squeeze %34 : memref<1x256xf32, #tpu.memory_space<any>> -> memref<256xf32, #tpu.memory_space<any>>
      %c0_i32_22 = arith.constant 0 : i32
      %36 = tpu.memref_slice %arg7[%c0_i32_19, %c1_i32_18, %c0_i32_22] : memref<2x8x256xf32, #tpu.memory_space<vmem>> -> memref<1x1x256xf32, #tpu.memory_space<vmem>>
      %37 = tpu.memref_squeeze %36 : memref<1x1x256xf32, #tpu.memory_space<vmem>> -> memref<256xf32, #tpu.memory_space<vmem>>
      %38 = tpu.memref_slice %arg8[%c0_i32_20] : memref<2x!tpu.dma_semaphore, #tpu.memory_space<semaphore_mem>> -> memref<1x!tpu.dma_semaphore, #tpu.memory_space<semaphore_mem>>
      %39 = tpu.memref_squeeze %38 : memref<1x!tpu.dma_semaphore, #tpu.memory_space<semaphore_mem>> -> memref<!tpu.dma_semaphore, #tpu.memory_space<semaphore_mem>>
      tpu.enqueue_dma source(%35 : memref<256xf32, #tpu.memory_space<any>>) target(%37 : memref<256xf32, #tpu.memory_space<vmem>>) target_semaphore(%39 : memref<!tpu.dma_semaphore, #tpu.memory_space<semaphore_mem>>)
      %c2_i32_23 = arith.constant 2 : i32
      %40 = arith.addi %21, %c2_i32_23 : i32
      %41 = arith.index_cast %40 : i32 to index
      %42 = memref.load %arg2[%41] : memref<16xi32, #tpu.memory_space<smem>>
      %c0_i32_24 = arith.constant 0 : i32
      %c0_i32_25 = arith.constant 0 : i32
      %c0_i32_26 = arith.constant 0 : i32
      %43 = tpu.memref_slice %arg3[%42, %c0_i32_26] : memref<64x256xf32, #tpu.memory_space<any>> -> memref<1x256xf32, #tpu.memory_space<any>>
      %44 = tpu.memref_squeeze %43 : memref<1x256xf32, #tpu.memory_space<any>> -> memref<256xf32, #tpu.memory_space<any>>
      %c0_i32_27 = arith.constant 0 : i32
      %45 = tpu.memref_slice %arg7[%c0_i32_24, %c2_i32_23, %c0_i32_27] : memref<2x8x256xf32, #tpu.memory_space<vmem>> -> memref<1x1x256xf32, #tpu.memory_space<vmem>>
      %46 = tpu.memref_squeeze %45 : memref<1x1x256xf32, #tpu.memory_space<vmem>> -> memref<256xf32, #tpu.memory_space<vmem>>
      %47 = tpu.memref_slice %arg8[%c0_i32_25] : memref<2x!tpu.dma_semaphore, #tpu.memory_space<semaphore_mem>> -> memref<1x!tpu.dma_semaphore, #tpu.memory_space<semaphore_mem>>
      %48 = tpu.memref_squeeze %47 : memref<1x!tpu.dma_semaphore, #tpu.memory_space<semaphore_mem>> -> memref<!tpu.dma_semaphore, #tpu.memory_space<semaphore_mem>>
      tpu.enqueue_dma source(%44 : memref<256xf32, #tpu.memory_space<any>>) target(%46 : memref<256xf32, #tpu.memory_space<vmem>>) target_semaphore(%48 : memref<!tpu.dma_semaphore, #tpu.memory_space<semaphore_mem>>)
      %c3_i32 = arith.constant 3 : i32
      %49 = arith.addi %21, %c3_i32 : i32
      %50 = arith.index_cast %49 : i32 to index
      %51 = memref.load %arg2[%50] : memref<16xi32, #tpu.memory_space<smem>>
      %c0_i32_28 = arith.constant 0 : i32
      %c0_i32_29 = arith.constant 0 : i32
      %c0_i32_30 = arith.constant 0 : i32
      %52 = tpu.memref_slice %arg3[%51, %c0_i32_30] : memref<64x256xf32, #tpu.memory_space<any>> -> memref<1x256xf32, #tpu.memory_space<any>>
      %53 = tpu.memref_squeeze %52 : memref<1x256xf32, #tpu.memory_space<any>> -> memref<256xf32, #tpu.memory_space<any>>
      %c0_i32_31 = arith.constant 0 : i32
      %54 = tpu.memref_slice %arg7[%c0_i32_28, %c3_i32, %c0_i32_31] : memref<2x8x256xf32, #tpu.memory_space<vmem>> -> memref<1x1x256xf32, #tpu.memory_space<vmem>>
      %55 = tpu.memref_squeeze %54 : memref<1x1x256xf32, #tpu.memory_space<vmem>> -> memref<256xf32, #tpu.memory_space<vmem>>
      %56 = tpu.memref_slice %arg8[%c0_i32_29] : memref<2x!tpu.dma_semaphore, #tpu.memory_space<semaphore_mem>> -> memref<1x!tpu.dma_semaphore, #tpu.memory_space<semaphore_mem>>
      %57 = tpu.memref_squeeze %56 : memref<1x!tpu.dma_semaphore, #tpu.memory_space<semaphore_mem>> -> memref<!tpu.dma_semaphore, #tpu.memory_space<semaphore_mem>>
      tpu.enqueue_dma source(%53 : memref<256xf32, #tpu.memory_space<any>>) target(%55 : memref<256xf32, #tpu.memory_space<vmem>>) target_semaphore(%57 : memref<!tpu.dma_semaphore, #tpu.memory_space<semaphore_mem>>)
      %c4_i32 = arith.constant 4 : i32
      %58 = arith.addi %21, %c4_i32 : i32
      %59 = arith.index_cast %58 : i32 to index
      %60 = memref.load %arg2[%59] : memref<16xi32, #tpu.memory_space<smem>>
      %c0_i32_32 = arith.constant 0 : i32
      %c0_i32_33 = arith.constant 0 : i32
      %c0_i32_34 = arith.constant 0 : i32
      %61 = tpu.memref_slice %arg3[%60, %c0_i32_34] : memref<64x256xf32, #tpu.memory_space<any>> -> memref<1x256xf32, #tpu.memory_space<any>>
      %62 = tpu.memref_squeeze %61 : memref<1x256xf32, #tpu.memory_space<any>> -> memref<256xf32, #tpu.memory_space<any>>
      %c0_i32_35 = arith.constant 0 : i32
      %63 = tpu.memref_slice %arg7[%c0_i32_32, %c4_i32, %c0_i32_35] : memref<2x8x256xf32, #tpu.memory_space<vmem>> -> memref<1x1x256xf32, #tpu.memory_space<vmem>>
      %64 = tpu.memref_squeeze %63 : memref<1x1x256xf32, #tpu.memory_space<vmem>> -> memref<256xf32, #tpu.memory_space<vmem>>
      %65 = tpu.memref_slice %arg8[%c0_i32_33] : memref<2x!tpu.dma_semaphore, #tpu.memory_space<semaphore_mem>> -> memref<1x!tpu.dma_semaphore, #tpu.memory_space<semaphore_mem>>
      %66 = tpu.memref_squeeze %65 : memref<1x!tpu.dma_semaphore, #tpu.memory_space<semaphore_mem>> -> memref<!tpu.dma_semaphore, #tpu.memory_space<semaphore_mem>>
      tpu.enqueue_dma source(%62 : memref<256xf32, #tpu.memory_space<any>>) target(%64 : memref<256xf32, #tpu.memory_space<vmem>>) target_semaphore(%66 : memref<!tpu.dma_semaphore, #tpu.memory_space<semaphore_mem>>)
      %c5_i32 = arith.constant 5 : i32
      %67 = arith.addi %21, %c5_i32 : i32
      %68 = arith.index_cast %67 : i32 to index
      %69 = memref.load %arg2[%68] : memref<16xi32, #tpu.memory_space<smem>>
      %c0_i32_36 = arith.constant 0 : i32
      %c0_i32_37 = arith.constant 0 : i32
      %c0_i32_38 = arith.constant 0 : i32
      %70 = tpu.memref_slice %arg3[%69, %c0_i32_38] : memref<64x256xf32, #tpu.memory_space<any>> -> memref<1x256xf32, #tpu.memory_space<any>>
      %71 = tpu.memref_squeeze %70 : memref<1x256xf32, #tpu.memory_space<any>> -> memref<256xf32, #tpu.memory_space<any>>
      %c0_i32_39 = arith.constant 0 : i32
      %72 = tpu.memref_slice %arg7[%c0_i32_36, %c5_i32, %c0_i32_39] : memref<2x8x256xf32, #tpu.memory_space<vmem>> -> memref<1x1x256xf32, #tpu.memory_space<vmem>>
      %73 = tpu.memref_squeeze %72 : memref<1x1x256xf32, #tpu.memory_space<vmem>> -> memref<256xf32, #tpu.memory_space<vmem>>
      %74 = tpu.memref_slice %arg8[%c0_i32_37] : memref<2x!tpu.dma_semaphore, #tpu.memory_space<semaphore_mem>> -> memref<1x!tpu.dma_semaphore, #tpu.memory_space<semaphore_mem>>
      %75 = tpu.memref_squeeze %74 : memref<1x!tpu.dma_semaphore, #tpu.memory_space<semaphore_mem>> -> memref<!tpu.dma_semaphore, #tpu.memory_space<semaphore_mem>>
      tpu.enqueue_dma source(%71 : memref<256xf32, #tpu.memory_space<any>>) target(%73 : memref<256xf32, #tpu.memory_space<vmem>>) target_semaphore(%75 : memref<!tpu.dma_semaphore, #tpu.memory_space<semaphore_mem>>)
      %c6_i32 = arith.constant 6 : i32
      %76 = arith.addi %21, %c6_i32 : i32
      %77 = arith.index_cast %76 : i32 to index
      %78 = memref.load %arg2[%77] : memref<16xi32, #tpu.memory_space<smem>>
      %c0_i32_40 = arith.constant 0 : i32
      %c0_i32_41 = arith.constant 0 : i32
      %c0_i32_42 = arith.constant 0 : i32
      %79 = tpu.memref_slice %arg3[%78, %c0_i32_42] : memref<64x256xf32, #tpu.memory_space<any>> -> memref<1x256xf32, #tpu.memory_space<any>>
      %80 = tpu.memref_squeeze %79 : memref<1x256xf32, #tpu.memory_space<any>> -> memref<256xf32, #tpu.memory_space<any>>
      %c0_i32_43 = arith.constant 0 : i32
      %81 = tpu.memref_slice %arg7[%c0_i32_40, %c6_i32, %c0_i32_43] : memref<2x8x256xf32, #tpu.memory_space<vmem>> -> memref<1x1x256xf32, #tpu.memory_space<vmem>>
      %82 = tpu.memref_squeeze %81 : memref<1x1x256xf32, #tpu.memory_space<vmem>> -> memref<256xf32, #tpu.memory_space<vmem>>
      %83 = tpu.memref_slice %arg8[%c0_i32_41] : memref<2x!tpu.dma_semaphore, #tpu.memory_space<semaphore_mem>> -> memref<1x!tpu.dma_semaphore, #tpu.memory_space<semaphore_mem>>
      %84 = tpu.memref_squeeze %83 : memref<1x!tpu.dma_semaphore, #tpu.memory_space<semaphore_mem>> -> memref<!tpu.dma_semaphore, #tpu.memory_space<semaphore_mem>>
      tpu.enqueue_dma source(%80 : memref<256xf32, #tpu.memory_space<any>>) target(%82 : memref<256xf32, #tpu.memory_space<vmem>>) target_semaphore(%84 : memref<!tpu.dma_semaphore, #tpu.memory_space<semaphore_mem>>)
      %c7_i32 = arith.constant 7 : i32
      %85 = arith.addi %21, %c7_i32 : i32
      %86 = arith.index_cast %85 : i32 to index
      %87 = memref.load %arg2[%86] : memref<16xi32, #tpu.memory_space<smem>>
      %c0_i32_44 = arith.constant 0 : i32
      %c0_i32_45 = arith.constant 0 : i32
      %c0_i32_46 = arith.constant 0 : i32
      %88 = tpu.memref_slice %arg3[%87, %c0_i32_46] : memref<64x256xf32, #tpu.memory_space<any>> -> memref<1x256xf32, #tpu.memory_space<any>>
      %89 = tpu.memref_squeeze %88 : memref<1x256xf32, #tpu.memory_space<any>> -> memref<256xf32, #tpu.memory_space<any>>
      %c0_i32_47 = arith.constant 0 : i32
      %90 = tpu.memref_slice %arg7[%c0_i32_44, %c7_i32, %c0_i32_47] : memref<2x8x256xf32, #tpu.memory_space<vmem>> -> memref<1x1x256xf32, #tpu.memory_space<vmem>>
      %91 = tpu.memref_squeeze %90 : memref<1x1x256xf32, #tpu.memory_space<vmem>> -> memref<256xf32, #tpu.memory_space<vmem>>
      %92 = tpu.memref_slice %arg8[%c0_i32_45] : memref<2x!tpu.dma_semaphore, #tpu.memory_space<semaphore_mem>> -> memref<1x!tpu.dma_semaphore, #tpu.memory_space<semaphore_mem>>
      %93 = tpu.memref_squeeze %92 : memref<1x!tpu.dma_semaphore, #tpu.memory_space<semaphore_mem>> -> memref<!tpu.dma_semaphore, #tpu.memory_space<semaphore_mem>>
      tpu.enqueue_dma source(%89 : memref<256xf32, #tpu.memory_space<any>>) target(%91 : memref<256xf32, #tpu.memory_space<vmem>>) target_semaphore(%93 : memref<!tpu.dma_semaphore, #tpu.memory_space<semaphore_mem>>)
      %c8_i32_48 = arith.constant 8 : i32
    } else {
    }
    %c0_i32_1 = arith.constant 0 : i32
    %c0_i32_2 = arith.constant 0 : i32
    %4 = tpu.memref_slice %arg7[%0, %c0_i32_1, %c0_i32_2] : memref<2x8x256xf32, #tpu.memory_space<vmem>> -> memref<1x8x256xf32, #tpu.memory_space<vmem>>
    %5 = tpu.memref_squeeze %4 : memref<1x8x256xf32, #tpu.memory_space<vmem>> -> memref<8x256xf32, #tpu.memory_space<vmem>>
    %c0_i32_3 = arith.constant 0 : i32
    %c0_i32_4 = arith.constant 0 : i32
    %6 = tpu.memref_slice %arg7[%0, %c0_i32_3, %c0_i32_4] : memref<2x8x256xf32, #tpu.memory_space<vmem>> -> memref<1x8x256xf32, #tpu.memory_space<vmem>>
    %7 = tpu.memref_squeeze %6 : memref<1x8x256xf32, #tpu.memory_space<vmem>> -> memref<8x256xf32, #tpu.memory_space<vmem>>
    %8 = tpu.memref_slice %arg8[%0] : memref<2x!tpu.dma_semaphore, #tpu.memory_space<semaphore_mem>> -> memref<1x!tpu.dma_semaphore, #tpu.memory_space<semaphore_mem>>
    %9 = tpu.memref_squeeze %8 : memref<1x!tpu.dma_semaphore, #tpu.memory_space<semaphore_mem>> -> memref<!tpu.dma_semaphore, #tpu.memory_space<semaphore_mem>>
    tpu.wait_dma2 semaphore(%9 : memref<!tpu.dma_semaphore, #tpu.memory_space<semaphore_mem>>) src(%5 : memref<8x256xf32, #tpu.memory_space<vmem>>) dst(%7 : memref<8x256xf32, #tpu.memory_space<vmem>>)
    %c0 = arith.constant 0 : index
    %c0_5 = arith.constant 0 : index
    %10 = vector.load %arg4[%c0, %c0_5] : memref<8x8xf32, #tpu.memory_space<vmem>>, vector<8x8xf32>
    %cst = arith.constant 2.000000e+00 : f32
    %11 = vector.broadcast %cst : f32 to vector<8x8xf32>
    %12 = arith.mulf %10, %11 : vector<8x8xf32>
    %c0_6 = arith.constant 0 : index
    %c0_7 = arith.constant 0 : index
    %13 = vector.load %arg5[%c0_6, %c0_7] : memref<8x256xf32, #tpu.memory_space<vmem>>, vector<8x256xf32>
    %cst_8 = arith.constant dense<0.000000e+00> : vector<8x256xf32>
    %14 = tpu.matmul %12, %13, %cst_8 {dimension_numbers = #tpu.dot_dimension_numbers<[1], [0], [0], [1], [0, 0, 1, 1], [], []>} : vector<8x8xf32>, vector<8x256xf32>, vector<8x256xf32> -> vector<8x256xf32>
    %15 = arith.index_cast %0 : i32 to index
    %c0_9 = arith.constant 0 : index
    %c0_10 = arith.constant 0 : index
    %16 = vector.load %arg7[%15, %c0_9, %c0_10] : memref<2x8x256xf32, #tpu.memory_space<vmem>>, vector<1x8x256xf32>
    %17 = vector.shape_cast %16 : vector<1x8x256xf32> to vector<8x256xf32>
    %18 = arith.addf %17, %14 : vector<8x256xf32>
    %c0_11 = arith.constant 0 : index
    %c0_12 = arith.constant 0 : index
    %19 = vector.load %arg6[%c0_11, %c0_12] : memref<8x256xf32, #tpu.memory_space<vmem>>, vector<8x256xf32>
    tpu.vector_store %arg6[%c0_11, %c0_12], %18 {strides = array<i32>} : memref<8x256xf32, #tpu.memory_space<vmem>>, vector<8x256xf32>,
    return
  }
  func.func @transform_1(%arg0: i32, %arg1: i32, %arg2: memref<16xi32, #tpu.memory_space<smem>>) -> (i32, i32) {
    %c1_i32 = arith.constant 1 : i32
    %0 = arith.muli %arg0, %c1_i32 : i32
    %1 = arith.addi %0, %arg1 : i32
    %c0_i32 = arith.constant 0 : i32
    %c0_i32_0 = arith.constant 0 : i32
    return %1, %c0_i32 : i32, i32
  }
  func.func @transform_2(%arg0: i32, %arg1: i32, %arg2: memref<16xi32, #tpu.memory_space<smem>>) -> (i32, i32) {
    %c0_i32 = arith.constant 0 : i32
    %c0_i32_0 = arith.constant 0 : i32
    %c0_i32_1 = arith.constant 0 : i32
    return %c0_i32, %c0_i32_0 : i32, i32
  }
  func.func @transform_3(%arg0: i32, %arg1: i32, %arg2: memref<16xi32, #tpu.memory_space<smem>>) -> (i32, i32) {
    %c1_i32 = arith.constant 1 : i32
    %0 = arith.muli %arg0, %c1_i32 : i32
    %1 = arith.addi %0, %arg1 : i32
    %c0_i32 = arith.constant 0 : i32
    %c0_i32_0 = arith.constant 0 : i32
    return %1, %c0_i32 : i32, i32
  }
}

</mosaic_0001>

<bundles_post_ra>
// kernel: tpu_custom_call.1
= control target key start
LH: loop header
LB: loop body
LE: loop exit
PB: predicated region body
PF: predicated region fallthrough
CT: control target
= control target key end

     0   :  { %s876_s18 = smov [#allocation5]   ;;  %s1148_s0 = inlined_call_operand.vmem [shape: s32[16], index: 0, kind: input, shape index: {}]   ;;  %s1149_s1 = inlined_call_operand.hbm [shape: f32[64,256], index: 1, kind: input, shape index: {}]   ;;  %s1150_s2 = inlined_call_operand.vmem [shape: f32[16,8], index: 2, kind: input, shape index: {}]   ;;  %s1151_s3 = inlined_call_operand.vmem [shape: f32[8,256], index: 3, kind: input, shape index: {}]   ;;  %s1152_s4 = inlined_call_operand.hbm [shape: f32[16,256], index: 4, kind: output, shape index: {}]  }
   0x1   :  { %1159 = sst [smem:[#allocation25_spill]] %s1150_s2  ;;  %s10_s17 = sshll.u32 %s1148_s0, 4  ;;  %s11_s17 = int_to_ptr.vmem [resolvable:$true] %s10_s17 }
   0x2   :  { %13 = dma.vmem_to_smem %s11_s17, 16, %s876_s18, [#allocation4] }
   0x3   :  { %844 = dma.done.wait [#allocation4], 16 }
   0x4   :  { %845 = vsyncadd [#allocation4], 4294967280 }
   0x5   :  { %16 = sfence }
   0x6   :  { %17 = vsyncpa [#allocation7], 0 }
   0x7   :  { %19 = vsyncpa [#allocation7 + $0x1], 0  ;;  %s915_s19 = smov 0   ;;  %s917_s20 = smov 0  }
   0x8   :  { %s919_s21 = smov 0   ;;  %s921_s22 = smov 0  }
   0x9   :  { %s923_s23 = smov 0   ;;  %s925_s24 = smov 0  }
   0xa LB: > { %1160 = sst [smem:[#allocation19_spill]] %s854_s19  ;;  %s496_s0 = sadd.s32 4294967295, %s874_s24   ;;  %s874_s24 = sphi %s925_s24, %s25_s24   ;;  %s870_s23 = sphi %s923_s23, %s1175_s23   ;;  %s866_s22 = sphi %s921_s22, %s1174_s22   ;;  %s862_s21 = sphi %s919_s21, %s1173_s21   ;;  %s858_s20 = sphi %s917_s20, %s1177_s20   ;;  %s854_s19 = sphi %s915_s19, %s1176_s19  }
   0xb   : > { %1161 = sst [smem:[#allocation20_spill]] %s862_s21  ;;  %s497_s25 = sadd.s32 4294967294, %s874_s24  }
   0xc   : > { %1162 = sst [smem:[#allocation21_spill]] %s870_s23  ;;  %s37_s26 = sadd.s32 1, %s870_s23 }
   0xd   : > { %s95_s27 = sadd.s32 1, %s862_s21  ;;  %p39_p0 = scmp.ge.s32.totalorder %s37_s26, 2 }
   0xe   : > { %p105_p1 = scmp.ne.s32.totalorder %s862_s21, %s858_s20  ;;  %p106_p2 = scmp.eq.s32.totalorder %s496_s0, 1 }
   0xf   : > { %p111_p3 = scmp.ne.s32.totalorder %s858_s20, %s854_s19  ;;  %s1179_s26 = smov (%p39_p0, %s37_s26), 0 }
  0x10   : > { %1163 = sst [smem:[#allocation22_spill]] %s1179_s26  ;;  %p955_p4 = por %p106_p2, %p105_p1 }
  0x11   : > { %p112_p5 = scmp.eq.s32.totalorder %s497_s25, 1  ;;  %s92_s29 = ssub.s32 %s870_s23, %s1179_s26 }
  0x12   : > { %p500_p6 = scmp.ge.s32.totalorder %s874_s24, 1  ;;  %p93_p7 = scmp.eq.s32.totalorder %s92_s29, 0 }
  0x13   : > { %p962_p8 = por %p112_p5, %p111_p3  ;;  %p142_p9 = scmp.lt.s32.totalorder %s874_s24, 3 }
  0x14   : > { %s968_s5 = scalar_select %p93_p7, %s862_s21, %s95_s27  }
  0x15   : > { %s1165_s30 = scalar_select %p962_p8, 1, 0 }
  0x16   : > { %1167 = sst [smem:[#allocation24_spill]] %s968_s5  ;;  %p143_p10 = pnand %p500_p6, %p142_p9 }
  0x17   : > { %1166 = sst [smem:[#allocation23_spill]] %s1165_s30  ;;  %s1153_s6 = sand.u32 (!%p143_p10), 1, %s858_s20  }
  0x18   : > { %146 = sbr.rel (%p143_p10) target bundleno = 291 (0x123), region = 28  ;;  %p165_p11 = scmp.lt.s32.totalorder (!%p143_p10), %s866_s22, 1 }
  0x19   : > { %s974_s7 = sshll.u32 (!%p143_p10), %s1153_s6, 4  ;;  %s977_s8 = sshll.u32 (!%p143_p10), %s866_s22, 3 }
  0x1a   : > { %s182_s9 = sld [smem:[#allocation5 + %s977_s8]] (!%p143_p10)  ;;  %s877_s12 = smov (!%p143_p10), [#allocation2]  }
  0x1b   : > { %s981_s13 = sshll.u32 (!%p143_p10), %s877_s12, 4  ;;  %s1168_s2 = sld [smem:[#allocation25_spill]] (!%p143_p10)  ;;  %s191_s13 = int_to_ptr.vmem [resolvable:$true] %s981_s13 }
  0x1c   : > { %s196_s17 = sadd.s32 (!%p143_p10), 1, %s977_s8  ;;  %s878_s12 = smov (!%p143_p10), [#allocation2 + $0x1]  }
  0x1d   : > { %s166_s10 = scalar_select %p165_p11, %s866_s22, 1 }
  0x1e   : > { %s197_s27 = sld [smem:[#allocation5 + %s196_s17]]  ;;  %s993_s5 = sshll.u32 %s878_s12, 4  ;;  %s207_s5 = int_to_ptr.vmem [resolvable:$true] %s993_s5 }
  0x1f   : > { %s502_s11 = sshll.u32 %s166_s10, 3  ;;  %s212_s14 = sadd.s32 2, %s977_s8 }
  0x20   : > { %s183_s18 = sshrl.u32 %s182_s9, 3  ;;  %s184_s0 = sand.u32 7, %s182_s9  }
  0x21   : > { %s986_s16 = scalar_lea.vmem %s1168_s2, %s502_s11  ;;  %s504_s25 = sshll.u32 %s183_s18, 4 }
  0x22   : > { %s186_s29 = sadd.s32 %s504_s25, %s184_s0  ;;  %s999_s9 = scalar_lea.hbm %s1149_s1, 128 }
  0x23   : > { %s187_s10 = scalar_lea.hbm %s1149_s1, %s186_s29 }
  0x24   : > { %s188_s23 = sshll.u32 %s187_s10, 4  ;;  %s189_s23 = int_to_ptr.hbm [resolvable:$true] %s188_s23 }
  0x25   : > { %s600_s15 = sshra.s32 %s189_s23, 4  ;;  %s601_s15 = int_to_ptr.hbm [resolvable:$true] %s600_s15 }
  0x26   : > { %s602_s11 = scalar_lea.hbm %s601_s15, 2  ;;  %p605_p13 = scmp.lt.s32.totalorder %s601_s15, %s1149_s1 }
  0x27   : > { %p603_p12 = scmp.ne.s32.totalorder %s601_s15, %s602_s11  ;;  %p606_p0 = scmp.lt.s32.totalorder %s999_s9, %s602_s11 }
  0x29   : > { %p607_p1 = por %p606_p0, %p605_p13 }
  0x2b   : > { %p608_p2 = pnand %p607_p1, %p603_p12 }
  0x2d   : > { %611 = shalt.err (!%p608_p2)  }
  0x2e   : > { %s879_s26 = smov 128   ;;  %s880_s6 = smov 1  }
  0x2f   : > { %195 = dma.hbm_to_vmem [thread:$0]  %s189_s23, 32, %s191_s13, [#allocation3], %s879_s26, %s879_s26, %s880_s6 }
  0x30   : > { %s198_s2 = sshrl.u32 %s197_s27, 3  ;;  %s199_s21 = sand.u32 7, %s197_s27  }
  0x31   : > { %s505_s0 = sshll.u32 %s198_s2, 4  ;;  %s213_s25 = sld [smem:[#allocation5 + %s212_s14]] }
  0x32   : > { %s201_s29 = sadd.s32 %s505_s0, %s199_s21  ;;  %s881_s17 = smov [#allocation2 + $0x2]  }
  0x33   : > { %s202_s15 = scalar_lea.hbm %s1149_s1, %s201_s29  ;;  %s1012_s18 = sshll.u32 %s881_s17, 4  ;;  %s223_s18 = int_to_ptr.vmem [resolvable:$true] %s1012_s18 }
  0x34   : > { %s204_s11 = sshll.u32 %s202_s15, 4  ;;  %s228_s30 = sadd.s32 3, %s977_s8  ;;  %s205_s11 = int_to_ptr.hbm [resolvable:$true] %s204_s11 }
  0x35   : > { %s624_s19 = sshra.s32 %s205_s11, 4  ;;  %s625_s19 = int_to_ptr.hbm [resolvable:$true] %s624_s19 }
  0x36   : > { %s626_s23 = scalar_lea.hbm %s625_s19, 2  ;;  %p629_p5 = scmp.lt.s32.totalorder %s625_s19, %s1149_s1 }
  0x37   : > { %p627_p3 = scmp.ne.s32.totalorder %s625_s19, %s626_s23  ;;  %p630_p6 = scmp.lt.s32.totalorder %s999_s9, %s626_s23 }
  0x39   : > { %p631_p7 = por %p630_p6, %p629_p5 }
  0x3b   : > { %p632_p9 = pnand %p631_p7, %p627_p3 }
  0x3d   : > { %635 = shalt.err (!%p632_p9)  }
  0x3e   : > { %211 = dma.hbm_to_vmem [thread:$0]  %s205_s11, 32, %s207_s5, [#allocation3], %s879_s26, %s879_s26, %s880_s6 }
  0x3f   : > { %s214_s14 = sshrl.u32 %s213_s25, 3  ;;  %s215_s2 = sand.u32 7, %s213_s25  }
  0x40   : > { %s506_s21 = sshll.u32 %s214_s14, 4  ;;  %s229_s0 = sld [smem:[#allocation5 + %s228_s30]] }
  0x41   : > { %s217_s29 = sadd.s32 %s506_s21, %s215_s2  ;;  %s882_s17 = smov [#allocation2 + $0x3]  }
  0x42   : > { %s218_s19 = scalar_lea.hbm %s1149_s1, %s217_s29  ;;  %s1026_s23 = sshll.u32 %s882_s17, 4  ;;  %s239_s23 = int_to_ptr.vmem [resolvable:$true] %s1026_s23 }
  0x43   : > { %s220_s15 = sshll.u32 %s218_s19, 4  ;;  %s244_s13 = sadd.s32 4, %s977_s8  ;;  %s221_s15 = int_to_ptr.hbm [resolvable:$true] %s220_s15 }
  0x44   : > { %s648_s27 = sshra.s32 %s221_s15, 4  ;;  %s649_s27 = int_to_ptr.hbm [resolvable:$true] %s648_s27 }
  0x45   : > { %s650_s5 = scalar_lea.hbm %s649_s27, 2  ;;  %p653_p11 = scmp.lt.s32.totalorder %s649_s27, %s1149_s1 }
  0x46   : > { %p651_p10 = scmp.ne.s32.totalorder %s649_s27, %s650_s5  ;;  %p654_p12 = scmp.lt.s32.totalorder %s999_s9, %s650_s5 }
  0x48   : > { %p655_p13 = por %p654_p12, %p653_p11 }
  0x4a   : > { %p656_p0 = pnand %p655_p13, %p651_p10 }
  0x4c   : > { %659 = shalt.err (!%p656_p0)  }
  0x4d   : > { %227 = dma.hbm_to_vmem [thread:$0]  %s221_s15, 32, %s223_s18, [#allocation3], %s879_s26, %s879_s26, %s880_s6 }
  0x4e   : > { %s230_s30 = sshrl.u32 %s229_s0, 3  ;;  %s231_s14 = sand.u32 7, %s229_s0  }
  0x4f   : > { %s507_s2 = sshll.u32 %s230_s30, 4  ;;  %s245_s21 = sld [smem:[#allocation5 + %s244_s13]] }
  0x50   : > { %s233_s29 = sadd.s32 %s507_s2, %s231_s14  ;;  %s883_s27 = smov [#allocation2 + $0x4]  }
  0x51   : > { %s234_s19 = scalar_lea.hbm %s1149_s1, %s233_s29  ;;  %s1040_s5 = sshll.u32 %s883_s27, 4  ;;  %s255_s5 = int_to_ptr.vmem [resolvable:$true] %s1040_s5 }
  0x52   : > { %s236_s17 = sshll.u32 %s234_s19, 4  ;;  %s260_s25 = sadd.s32 5, %s977_s8  ;;  %s237_s17 = int_to_ptr.hbm [resolvable:$true] %s236_s17 }
  0x53   : > { %s672_s11 = sshra.s32 %s237_s17, 4  ;;  %s673_s11 = int_to_ptr.hbm [resolvable:$true] %s672_s11 }
  0x54   : > { %s674_s18 = scalar_lea.hbm %s673_s11, 2  ;;  %p677_p2 = scmp.lt.s32.totalorder %s673_s11, %s1149_s1 }
  0x55   : > { %p675_p1 = scmp.ne.s32.totalorder %s673_s11, %s674_s18  ;;  %p678_p3 = scmp.lt.s32.totalorder %s999_s9, %s674_s18 }
  0x57   : > { %p679_p5 = por %p678_p3, %p677_p2 }
  0x59   : > { %p680_p6 = pnand %p679_p5, %p675_p1 }
  0x5b   : > { %683 = shalt.err (!%p680_p6)  }
  0x5c   : > { %243 = dma.hbm_to_vmem [thread:$0]  %s237_s17, 32, %s239_s23, [#allocation3], %s879_s26, %s879_s26, %s880_s6 }
  0x5d   : > { %s246_s13 = sshrl.u32 %s245_s21, 3  ;;  %s247_s30 = sand.u32 7, %s245_s21  }
  0x5e   : > { %s508_s14 = sshll.u32 %s246_s13, 4  ;;  %s261_s2 = sld [smem:[#allocation5 + %s260_s25]] }
  0x5f   : > { %s249_s29 = sadd.s32 %s508_s14, %s247_s30  ;;  %s884_s11 = smov [#allocation2 + $0x5]  }
  0x60   : > { %s250_s19 = scalar_lea.hbm %s1149_s1, %s249_s29  ;;  %s1054_s18 = sshll.u32 %s884_s11, 4  ;;  %s271_s18 = int_to_ptr.vmem [resolvable:$true] %s1054_s18 }
  0x61   : > { %s252_s27 = sshll.u32 %s250_s19, 4  ;;  %s276_s0 = sadd.s32 6, %s977_s8  ;;  %s253_s27 = int_to_ptr.hbm [resolvable:$true] %s252_s27 }
  0x62   : > { %s696_s15 = sshra.s32 %s253_s27, 4  ;;  %s697_s15 = int_to_ptr.hbm [resolvable:$true] %s696_s15 }
  0x63   : > { %s698_s23 = scalar_lea.hbm %s697_s15, 2  ;;  %p701_p9 = scmp.lt.s32.totalorder %s697_s15, %s1149_s1 }
  0x64   : > { %p699_p7 = scmp.ne.s32.totalorder %s697_s15, %s698_s23  ;;  %p702_p10 = scmp.lt.s32.totalorder %s999_s9, %s698_s23 }
  0x66   : > { %p703_p11 = por %p702_p10, %p701_p9 }
  0x68   : > { %p704_p12 = pnand %p703_p11, %p699_p7 }
  0x6a   : > { %707 = shalt.err (!%p704_p12)  }
  0x6b   : > { %259 = dma.hbm_to_vmem [thread:$0]  %s253_s27, 32, %s255_s5, [#allocation3], %s879_s26, %s879_s26, %s880_s6 }
  0x6c   : > { %s262_s25 = sshrl.u32 %s261_s2, 3  ;;  %s263_s13 = sand.u32 7, %s261_s2  }
  0x6d   : > { %s509_s30 = sshll.u32 %s262_s25, 4  ;;  %s277_s14 = sld [smem:[#allocation5 + %s276_s0]] }
  0x6e   : > { %s265_s29 = sadd.s32 %s509_s30, %s263_s13  ;;  %s885_s15 = smov [#allocation2 + $0x6]  }
  0x6f   : > { %s266_s19 = scalar_lea.hbm %s1149_s1, %s265_s29  ;;  %s1068_s23 = sshll.u32 %s885_s15, 4  ;;  %s287_s23 = int_to_ptr.vmem [resolvable:$true] %s1068_s23 }
  0x70   : > { %s268_s11 = sshll.u32 %s266_s19, 4  ;;  %s292_s21 = sadd.s32 7, %s977_s8  ;;  %s269_s11 = int_to_ptr.hbm [resolvable:$true] %s268_s11 }
  0x71   : > { %s720_s17 = sshra.s32 %s269_s11, 4  ;;  %s721_s17 = int_to_ptr.hbm [resolvable:$true] %s720_s17 }
  0x72   : > { %s722_s5 = scalar_lea.hbm %s721_s17, 2  ;;  %p725_p0 = scmp.lt.s32.totalorder %s721_s17, %s1149_s1 }
  0x73   : > { %p723_p13 = scmp.ne.s32.totalorder %s721_s17, %s722_s5  ;;  %p726_p1 = scmp.lt.s32.totalorder %s999_s9, %s722_s5 }
  0x75   : > { %p727_p2 = por %p726_p1, %p725_p0 }
  0x77   : > { %p728_p3 = pnand %p727_p2, %p723_p13 }
  0x79   : > { %731 = shalt.err (!%p728_p3)  }
  0x7a   : > { %275 = dma.hbm_to_vmem [thread:$0]  %s269_s11, 32, %s271_s18, [#allocation3], %s879_s26, %s879_s26, %s880_s6 }
  0x7b   : > { %s278_s0 = sshrl.u32 %s277_s14, 3  ;;  %s279_s8 = sand.u32 7, %s277_s14  }
  0x7c   : > { %s510_s25 = sshll.u32 %s278_s0, 4  ;;  %s293_s13 = sld [smem:[#allocation5 + %s292_s21]] }
  0x7d   : > { %s281_s30 = sadd.s32 %s510_s25, %s279_s8  ;;  %s886_s15 = smov [#allocation2 + $0x7]  }
  0x7e   : > { %s282_s12 = scalar_lea.hbm %s1149_s1, %s281_s30  ;;  %s1082_s17 = sshll.u32 %s886_s15, 4  ;;  %s303_s17 = int_to_ptr.vmem [resolvable:$true] %s1082_s17 }
  0x7f   : > { %s284_s19 = sshll.u32 %s282_s12, 4  ;;  %s285_s19 = int_to_ptr.hbm [resolvable:$true] %s284_s19 }
  0x80   : > { %s744_s5 = sshra.s32 %s285_s19, 4  ;;  %s745_s5 = int_to_ptr.hbm [resolvable:$true] %s744_s5 }
  0x81   : > { %s746_s2 = scalar_lea.hbm %s745_s5, 2  ;;  %p749_p6 = scmp.lt.s32.totalorder %s745_s5, %s1149_s1 }
  0x82   : > { %p747_p5 = scmp.ne.s32.totalorder %s745_s5, %s746_s2  ;;  %p750_p7 = scmp.lt.s32.totalorder %s999_s9, %s746_s2 }
  0x84   : > { %p751_p9 = por %p750_p7, %p749_p6 }
  0x86   : > { %p752_p10 = pnand %p751_p9, %p747_p5 }
  0x88   : > { %755 = shalt.err (!%p752_p10)  }
  0x89   : > { %291 = dma.hbm_to_vmem [thread:$0]  %s285_s19, 32, %s287_s23, [#allocation3], %s879_s26, %s879_s26, %s880_s6 }
  0x8a   : > { %s294_s14 = sshrl.u32 %s293_s13, 3  ;;  %s295_s21 = sand.u32 7, %s293_s13  }
  0x8b   : > { %s511_s27 = sshll.u32 %s294_s14, 4 }
  0x8c   : > { %s297_s0 = sadd.s32 %s511_s27, %s295_s21 }
  0x8d   : > { %s298_s30 = scalar_lea.hbm %s1149_s1, %s297_s0 }
  0x8e   : > { %s300_s29 = sshll.u32 %s298_s30, 4  ;;  %s301_s29 = int_to_ptr.hbm [resolvable:$true] %s300_s29 }
  0x8f   : > { %s768_s10 = sshra.s32 %s301_s29, 4  ;;  %s769_s10 = int_to_ptr.hbm [resolvable:$true] %s768_s10 }
  0x90   : > { %s770_s12 = scalar_lea.hbm %s769_s10, 2  ;;  %p773_p12 = scmp.lt.s32.totalorder %s769_s10, %s1149_s1 }
  0x91   : > { %p771_p11 = scmp.ne.s32.totalorder %s769_s10, %s770_s12  ;;  %p774_p13 = scmp.lt.s32.totalorder %s999_s9, %s770_s12 }
  0x93   : > { %p775_p0 = por %p774_p13, %p773_p12 }
  0x95   : > { %p776_p1 = pnand %p775_p0, %p771_p11 }
  0x97   : > { %779 = shalt.err (!%p776_p1)  }
  0x98   : > { %307 = dma.hbm_to_vmem [thread:$0]  %s301_s29, 32, %s303_s17, [#allocation3], %s879_s26, %s879_s26, %s880_s6 }
  0x99   : > { %s163_s23 = scalar_lea.vmem [#allocation6], %s974_s7 }
  0x9a   : > { %846 = dma.done.wait [#allocation3], 256 }
  0x9b   : > { %847 = vsyncadd [#allocation3], 4294967040  ;;  %v318_v0 = vld [vmem:[%s1151_s3] sm:$0xff]  ;;  %v319_v1 = vld [vmem:[%s1151_s3 + $0x8] sm:$0xff]  ;;  %vm320_vm0 = vcmask 64512   ;;  %s521_s7 = sshll.u32 %s866_s22, 4 }
  0x9c   : > { %v316_v2 = vld [vmem:[%s986_s16] sm:$0xff]  ;;  %339 = vmatpush.msra.mxu0 %v318_v0  ;;  %359 = vmatpush.msra.mxu1 %v319_v1  ;;  %s383_s6 = scalar_lea.hbm %s1152_s4, %s521_s7  ;;  %v365_v5 = vld [vmem:[#allocation2 + $0x8] sm:$0xff]  ;;  %s385_s17 = sshll.u32 %s163_s23, 4  ;;  %s386_s17 = int_to_ptr.vmem [resolvable:$true] %s385_s17 }
  0x9d   : > { %v317_v3 = vmul.f32 2.0, %v316_v2  ;;  %v364_v4 = vld [vmem:[#allocation2] sm:$0xff]  ;;  %s387_s11 = sshll.u32 %s383_s6, 4  ;;  %s1169_s16 = sand.u32 1, %s858_s20   ;;  %s388_s11 = int_to_ptr.hbm [resolvable:$true] %s387_s11 }
  0x9e   : > { %s371_s14 = scalar_lea.sflag [#allocation7], %s1169_s16  ;;  %s806_s22 = sshra.s32 %s388_s11, 4  ;;  %s807_s22 = int_to_ptr.hbm [resolvable:$true] %s806_s22 }
  0x9f   : > { %512 = vmatmul.msk.f32.vlgmr.msra.gmra.mxu0 %vm320_vm0, %v317_v3  ;;  %513 = vmatmul.msk.f32.vlgmr.msra.gmra.mxu1 %vm320_vm0, %v317_v3  ;;  %s808_s21 = scalar_lea.hbm %s807_s22, 16  ;;  %s812_s8 = scalar_lea.hbm %s1152_s4, 32 }
  0xa0   : > { %p809_p2 = scmp.ne.s32.totalorder %s807_s22, %s808_s21  ;;  %p813_p6 = scmp.lt.s32.totalorder %s807_s22, %s1152_s4 }
  0xa1   : > { %p814_p7 = scmp.lt.s32.totalorder %s812_s8, %s808_s21 }
  0xa2   : > { %p810_p3 = pnand %p809_p2, %p955_p4 }
  0xa3   : > { %p815_p9 = por %p814_p7, %p813_p6 }
  0xa4   : > { %p811_p5 = pneg %p810_p3 }
  0xa6   : > { %p816_p10 = pnand %p815_p9, %p811_p5 }
 0x11c   : > { %v341_v6 = vpop.f32.mrf.mxu0  ;;  %v361_v7 = vpop.f32.mrf.mxu1 }
 0x11d   : > { %v366_v8 = vadd.f32 %v364_v4, %v341_v6  ;;  %v367_v9 = vadd.f32 %v365_v5, %v361_v7 }
 0x11f   : > { %368 = vst [vmem:[%s163_s23] sm:$0xff] %v366_v8 }
 0x120   : > { %369 = vst [vmem:[%s163_s23 + $0x8] sm:$0xff] %v367_v9 }
 0x121   : > { %819 = shalt.err (!%p816_p10)
}
 0x122   : > { %522 = dma.vmem_to_hbm [thread:$0]  (%p955_p4), %s386_s17, 256, %s388_s11, %s371_s14  }
 0x123 PF: > { %s1170_s29 = sld [smem:[#allocation19_spill]]  ;;  %p528_p11 = scmp.ge.s32.totalorder %s874_s24, 2 }
 0x125   : > { %p525_p12 = pnand %p528_p11, %p962_p8 }
 0x127   : > { %p526_p13 = pneg %p525_p12 }
 0x129   : > { %s399_s12 = sand.u32 1, %s1170_s29  }
 0x12a   : > { %s400_s15 = scalar_lea.sflag [#allocation7], %s399_s12 }
 0x12b   : > { %849 = dma.done.wait (%p526_p13), %s400_s15, 256  }
 0x12c   : > { %851 = vsyncadd (%p526_p13), %s400_s15, 4294967040  ;;  %s25_s24 = sadd.s32 1, %s874_s24   ;;  %s1172_s5 = sld [smem:[#allocation20_spill]] }
 0x12d   : > { %p22_p0 = scmp.ge.s32.totalorder %s25_s24, 4   ;;  %s1173_s21 = sld [smem:[#allocation24_spill]] }
 0x12e   : > { %s1174_s22 = sld [smem:[#allocation21_spill]]  ;;  %s1176_s19 = smov %s858_s20 }
 0x12f   : > { %s1175_s23 = sld [smem:[#allocation22_spill]]  ;;  %24 = sbr.rel (!%p22_p0) target bundleno = 10 (0xa), region = 85 }
 0x132   : > { %s1177_s20 = smov %s1172_s5 }
 0x134   :  { %406 = vsyncpa [#allocation7], 1 }
 0x135   :  { %408 = vsyncpa [#allocation7 + $0x1], 1 }
 0x136   :  { %409 = vsyncmov [#allocation3] }
 0x139   :  { %s410_s28 = vpop.sfrf %409 }
 0x13a   :  { %p519_p4 = scmp.ne.s32.totalorder %s410_s28, 0 }
 0x13c   :  { %414 = shalt.err (%p519_p4)  }
 0x13d   :  { %416 = vsyncmov [#allocation3 + $0x1] }
 0x140   :  { %s417_s13 = vpop.sfrf %416 }
 0x141   :  { %p520_p8 = scmp.ne.s32.totalorder %s417_s13, 0 }
 0x143   :  { %421 = shalt.err (%p520_p8)  }

</bundles_post_ra>
